<compile_context>
chip_gen: v7x
topology: tpu7x:2x2x1
jax: 0.10.0
libtpu: 0.0.40
codegen_flags: <defaults>
</compile_context>

<pallas_src>
import functools

import jax
import jax.numpy as jnp
from jax import lax
from jax.experimental import pallas as pl
from jax.experimental.pallas import tpu as pltpu

BN_EPS = 1e-5
LEAKY_SLOPE = 0.01     # F.leaky_relu default negative_slope
F_PAD = 128            # lane-dense padded feature width


def _bn_lrelu(y, gamma, beta):
    """Train-mode BatchNorm1d (biased batch var) + LeakyReLU, f32 throughout."""
    mean = jnp.mean(y, axis=0, keepdims=True)                 # [1, F]  (XLU reduction)
    centered = y - mean                                       # reused for var + norm
    var = jnp.mean(centered * centered, axis=0, keepdims=True)
    scale = gamma * lax.rsqrt(var + BN_EPS)                   # rsqrt -> EUP slot
    y = centered * scale + beta
    return jnp.where(y >= 0, y, LEAKY_SLOPE * y)


def _generator_kernel(x_ref, w0_ref, w1_ref, w2_ref, bn_ref, o_ref):
    # x_ref: [B, 128] bf16; w*_ref: [128, 128] bf16; bn_ref: [8, 128] f32
    bn = bn_ref[...]

    h = jnp.dot(x_ref[...], w0_ref[...], preferred_element_type=jnp.float32)
    h = _bn_lrelu(h, bn[0:1, :], bn[1:2, :])

    h = jnp.dot(h.astype(jnp.bfloat16), w1_ref[...], preferred_element_type=jnp.float32)
    h = _bn_lrelu(h, bn[2:3, :], bn[3:4, :])

    h = jnp.dot(h.astype(jnp.bfloat16), w2_ref[...], preferred_element_type=jnp.float32)
    h = _bn_lrelu(h, bn[4:5, :], bn[5:6, :])

    o_ref[...] = jnp.tanh(h).astype(o_ref.dtype)


@functools.partial(jax.jit, static_argnames=("out_samples",))
def linear_generator_forward(x, w0, w1, w2, bn, *, out_samples):
    """x: [B, in_samples] (or [B, 1, in_samples]). Returns [B, out_samples] f32."""
    if x.ndim == 3 and x.shape[1] == 1:
        x = x.reshape(-1, x.shape[2])
    assert x.ndim == 2, "dimensionality of data array is incorrect"

    B, in_samples = x.shape
    # Lane-dense, zero-padded, bf16 input (exact: padded columns hit zero weight rows).
    x_p = jnp.zeros((B, F_PAD), jnp.bfloat16).at[:, :in_samples].set(
        x.astype(jnp.bfloat16))

    vmem = pl.BlockSpec(memory_space=pltpu.MemorySpace.VMEM)

    flops = 3 * 2 * B * F_PAD * F_PAD + 12 * B * F_PAD
    transcendentals = 3 * F_PAD + B * F_PAD  # 3x rsqrt rows + tanh
    bytes_accessed = (x_p.size * 2 + 3 * F_PAD * F_PAD * 2
                      + 8 * F_PAD * 4 + B * F_PAD * 4)

    out_p = pl.pallas_call(
        _generator_kernel,
        out_shape=jax.ShapeDtypeStruct((B, F_PAD), jnp.float32),
        in_specs=[vmem, vmem, vmem, vmem, vmem],
        out_specs=vmem,
        cost_estimate=pl.CostEstimate(
            flops=flops, transcendentals=transcendentals,
            bytes_accessed=bytes_accessed),
        compiler_params=pltpu.CompilerParams(
            vmem_limit_bytes=32 * 1024 * 1024),
    )(x_p, w0, w1, w2, bn)

    return out_p[:, :out_samples]


def init_params(key, in_samples, out_samples, hidden_sample_count=15):
    """Build padded, packed parameters matching the PyTorch module.

    Linear weights: kaiming_normal_ (fan_in, leaky_relu gain=sqrt(2)), stored transposed
    as [in, out], zero-padded to [128, 128] and cast to bf16 for the MXU.
    Linear bias is omitted (exactly cancelled by train-mode BatchNorm's mean subtraction).
    BatchNorm: gamma=1, beta=0 (PyTorch default), zero-padded, packed into one [8,128] f32.
    """
    def make_weight(k, fan_in, fan_out):
        std = (2.0 / fan_in) ** 0.5
        w = jax.random.normal(k, (fan_in, fan_out), jnp.float32) * std
        w_p = jnp.zeros((F_PAD, F_PAD), jnp.float32).at[:fan_in, :fan_out].set(w)
        return w_p.astype(jnp.bfloat16)

    def bn_rows(fan_out):
        gamma = jnp.zeros((F_PAD,), jnp.float32).at[:fan_out].set(1.0)
        beta = jnp.zeros((F_PAD,), jnp.float32)
        return gamma, beta

    k0, k1, k2 = jax.random.split(key, 3)
    w0 = make_weight(k0, in_samples, hidden_sample_count)          # fc_l0
    w1 = make_weight(k1, hidden_sample_count, hidden_sample_count)  # hidden_layers[0]
    w2 = make_weight(k2, hidden_sample_count, out_samples)          # fc_l2

    g0, be0 = bn_rows(hidden_sample_count)   # bn0
    g1, be1 = bn_rows(hidden_sample_count)   # hidden_bn_layers[0]
    g2, be2 = bn_rows(out_samples)           # bn2
    zero = jnp.zeros((F_PAD,), jnp.float32)
    bn = jnp.stack([g0, be0, g1, be1, g2, be2, zero, zero], axis=0)  # [8, 128]

    return w0, w1, w2, bn


if __name__ == "__main__":
    key = jax.random.PRNGKey(0)
    k_x, k_p = jax.random.split(key)

    batch = 8
    in_samples = 16
    out_samples = 12
    hidden_sample_count = 15  # module default

    x = jax.random.normal(k_x, (batch, in_samples), jnp.float32)
    w0, w1, w2, bn = init_params(k_p, in_samples, out_samples, hidden_sample_count)

    out = linear_generator_forward(x, w0, w1, w2, bn, out_samples=out_samples)
    out = jax.block_until_ready(out)

    assert out.shape == (batch, out_samples)
    assert out.dtype == jnp.float32
    assert bool(jnp.all(jnp.isfinite(out)))
    assert bool(jnp.all(jnp.abs(out) <= 1.0))  # tanh range
    print("KERNEL_OK")
</pallas_src>

<mosaic_0001>
module attributes {stable_mosaic.version = 11 : i64} {
  func.func @_generator_kernel(%arg0: memref<8x128xbf16, #tpu.memory_space<vmem>>, %arg1: memref<128x128xbf16, #tpu.memory_space<vmem>>, %arg2: memref<128x128xbf16, #tpu.memory_space<vmem>>, %arg3: memref<128x128xbf16, #tpu.memory_space<vmem>>, %arg4: memref<8x128xf32, #tpu.memory_space<vmem>>, %arg5: memref<8x128xf32, #tpu.memory_space<vmem>>) attributes {dimension_semantics = [], scalar_prefetch = 0 : i64, scratch_operands = 0 : i64, tpu.core_type = #tpu.core_type<tc>} {
    %c0 = arith.constant 0 : index
    %c0_0 = arith.constant 0 : index
    %0 = vector.load %arg4[%c0, %c0_0] : memref<8x128xf32, #tpu.memory_space<vmem>>, vector<8x128xf32>
    %c0_1 = arith.constant 0 : index
    %c0_2 = arith.constant 0 : index
    %1 = vector.load %arg0[%c0_1, %c0_2] : memref<8x128xbf16, #tpu.memory_space<vmem>>, vector<8x128xbf16>
    %c0_3 = arith.constant 0 : index
    %c0_4 = arith.constant 0 : index
    %2 = vector.load %arg1[%c0_3, %c0_4] : memref<128x128xbf16, #tpu.memory_space<vmem>>, vector<128x128xbf16>
    %cst = arith.constant dense<0.000000e+00> : vector<8x128xf32>
    %3 = tpu.matmul %1, %2, %cst {dimension_numbers = #tpu.dot_dimension_numbers<[1], [0], [0], [1], [0, 0, 1, 1], [], []>} : vector<8x128xbf16>, vector<128x128xbf16>, vector<8x128xf32> -> vector<8x128xf32>
    %4 = vector.extract_strided_slice %0 {offsets = [0, 0], sizes = [1, 128], strides = [1, 1]} : vector<8x128xf32> to vector<1x128xf32>
    %5 = vector.extract_strided_slice %0 {offsets = [1, 0], sizes = [1, 128], strides = [1, 1]} : vector<8x128xf32> to vector<1x128xf32>
    %cst_5 = arith.constant dense<0.000000e+00> : vector<128xf32>
    %6 = vector.multi_reduction <add>, %3, %cst_5 [0] : vector<8x128xf32> to vector<128xf32>
    %7 = vector.shape_cast %6 : vector<128xf32> to vector<1x128xf32>
    %cst_6 = arith.constant 8.000000e+00 : f32
    %8 = vector.broadcast %cst_6 : f32 to vector<1x128xf32>
    %9 = arith.divf %7, %8 : vector<1x128xf32>
    %10 = vector.broadcast %9 : vector<1x128xf32> to vector<8x128xf32>
    %11 = arith.subf %3, %10 : vector<8x128xf32>
    %12 = arith.mulf %11, %11 : vector<8x128xf32>
    %cst_7 = arith.constant dense<0.000000e+00> : vector<128xf32>
    %13 = vector.multi_reduction <add>, %12, %cst_7 [0] : vector<8x128xf32> to vector<128xf32>
    %14 = vector.shape_cast %13 : vector<128xf32> to vector<1x128xf32>
    %cst_8 = arith.constant 8.000000e+00 : f32
    %15 = vector.broadcast %cst_8 : f32 to vector<1x128xf32>
    %16 = arith.divf %14, %15 : vector<1x128xf32>
    %cst_9 = arith.constant 9.99999974E-6 : f32
    %17 = vector.broadcast %cst_9 : f32 to vector<1x128xf32>
    %18 = arith.addf %16, %17 : vector<1x128xf32>
    %19 = math.rsqrt %18 : vector<1x128xf32>
    %20 = arith.mulf %4, %19 : vector<1x128xf32>
    %21 = vector.broadcast %20 : vector<1x128xf32> to vector<8x128xf32>
    %22 = arith.mulf %11, %21 : vector<8x128xf32>
    %23 = vector.broadcast %5 : vector<1x128xf32> to vector<8x128xf32>
    %24 = arith.addf %22, %23 : vector<8x128xf32>
    %cst_10 = arith.constant 0.000000e+00 : f32
    %25 = vector.broadcast %cst_10 : f32 to vector<8x128xf32>
    %26 = arith.cmpf oge, %24, %25 : vector<8x128xf32>
    %cst_11 = arith.constant 0.00999999977 : f32
    %27 = vector.broadcast %cst_11 : f32 to vector<8x128xf32>
    %28 = arith.mulf %27, %24 : vector<8x128xf32>
    %29 = arith.select %26, %24, %28 : vector<8x128xi1>, vector<8x128xf32>
    %30 = arith.truncf %29 : vector<8x128xf32> to vector<8x128xbf16>
    %c0_12 = arith.constant 0 : index
    %c0_13 = arith.constant 0 : index
    %31 = vector.load %arg2[%c0_12, %c0_13] : memref<128x128xbf16, #tpu.memory_space<vmem>>, vector<128x128xbf16>
    %cst_14 = arith.constant dense<0.000000e+00> : vector<8x128xf32>
    %32 = tpu.matmul %30, %31, %cst_14 {dimension_numbers = #tpu.dot_dimension_numbers<[1], [0], [0], [1], [0, 0, 1, 1], [], []>} : vector<8x128xbf16>, vector<128x128xbf16>, vector<8x128xf32> -> vector<8x128xf32>
    %33 = vector.extract_strided_slice %0 {offsets = [2, 0], sizes = [1, 128], strides = [1, 1]} : vector<8x128xf32> to vector<1x128xf32>
    %34 = vector.extract_strided_slice %0 {offsets = [3, 0], sizes = [1, 128], strides = [1, 1]} : vector<8x128xf32> to vector<1x128xf32>
    %cst_15 = arith.constant dense<0.000000e+00> : vector<128xf32>
    %35 = vector.multi_reduction <add>, %32, %cst_15 [0] : vector<8x128xf32> to vector<128xf32>
    %36 = vector.shape_cast %35 : vector<128xf32> to vector<1x128xf32>
    %cst_16 = arith.constant 8.000000e+00 : f32
    %37 = vector.broadcast %cst_16 : f32 to vector<1x128xf32>
    %38 = arith.divf %36, %37 : vector<1x128xf32>
    %39 = vector.broadcast %38 : vector<1x128xf32> to vector<8x128xf32>
    %40 = arith.subf %32, %39 : vector<8x128xf32>
    %41 = arith.mulf %40, %40 : vector<8x128xf32>
    %cst_17 = arith.constant dense<0.000000e+00> : vector<128xf32>
    %42 = vector.multi_reduction <add>, %41, %cst_17 [0] : vector<8x128xf32> to vector<128xf32>
    %43 = vector.shape_cast %42 : vector<128xf32> to vector<1x128xf32>
    %cst_18 = arith.constant 8.000000e+00 : f32
    %44 = vector.broadcast %cst_18 : f32 to vector<1x128xf32>
    %45 = arith.divf %43, %44 : vector<1x128xf32>
    %cst_19 = arith.constant 9.99999974E-6 : f32
    %46 = vector.broadcast %cst_19 : f32 to vector<1x128xf32>
    %47 = arith.addf %45, %46 : vector<1x128xf32>
    %48 = math.rsqrt %47 : vector<1x128xf32>
    %49 = arith.mulf %33, %48 : vector<1x128xf32>
    %50 = vector.broadcast %49 : vector<1x128xf32> to vector<8x128xf32>
    %51 = arith.mulf %40, %50 : vector<8x128xf32>
    %52 = vector.broadcast %34 : vector<1x128xf32> to vector<8x128xf32>
    %53 = arith.addf %51, %52 : vector<8x128xf32>
    %cst_20 = arith.constant 0.000000e+00 : f32
    %54 = vector.broadcast %cst_20 : f32 to vector<8x128xf32>
    %55 = arith.cmpf oge, %53, %54 : vector<8x128xf32>
    %cst_21 = arith.constant 0.00999999977 : f32
    %56 = vector.broadcast %cst_21 : f32 to vector<8x128xf32>
    %57 = arith.mulf %56, %53 : vector<8x128xf32>
    %58 = arith.select %55, %53, %57 : vector<8x128xi1>, vector<8x128xf32>
    %59 = arith.truncf %58 : vector<8x128xf32> to vector<8x128xbf16>
    %c0_22 = arith.constant 0 : index
    %c0_23 = arith.constant 0 : index
    %60 = vector.load %arg3[%c0_22, %c0_23] : memref<128x128xbf16, #tpu.memory_space<vmem>>, vector<128x128xbf16>
    %cst_24 = arith.constant dense<0.000000e+00> : vector<8x128xf32>
    %61 = tpu.matmul %59, %60, %cst_24 {dimension_numbers = #tpu.dot_dimension_numbers<[1], [0], [0], [1], [0, 0, 1, 1], [], []>} : vector<8x128xbf16>, vector<128x128xbf16>, vector<8x128xf32> -> vector<8x128xf32>
    %62 = vector.extract_strided_slice %0 {offsets = [4, 0], sizes = [1, 128], strides = [1, 1]} : vector<8x128xf32> to vector<1x128xf32>
    %63 = vector.extract_strided_slice %0 {offsets = [5, 0], sizes = [1, 128], strides = [1, 1]} : vector<8x128xf32> to vector<1x128xf32>
    %cst_25 = arith.constant dense<0.000000e+00> : vector<128xf32>
    %64 = vector.multi_reduction <add>, %61, %cst_25 [0] : vector<8x128xf32> to vector<128xf32>
    %65 = vector.shape_cast %64 : vector<128xf32> to vector<1x128xf32>
    %cst_26 = arith.constant 8.000000e+00 : f32
    %66 = vector.broadcast %cst_26 : f32 to vector<1x128xf32>
    %67 = arith.divf %65, %66 : vector<1x128xf32>
    %68 = vector.broadcast %67 : vector<1x128xf32> to vector<8x128xf32>
    %69 = arith.subf %61, %68 : vector<8x128xf32>
    %70 = arith.mulf %69, %69 : vector<8x128xf32>
    %cst_27 = arith.constant dense<0.000000e+00> : vector<128xf32>
    %71 = vector.multi_reduction <add>, %70, %cst_27 [0] : vector<8x128xf32> to vector<128xf32>
    %72 = vector.shape_cast %71 : vector<128xf32> to vector<1x128xf32>
    %cst_28 = arith.constant 8.000000e+00 : f32
    %73 = vector.broadcast %cst_28 : f32 to vector<1x128xf32>
    %74 = arith.divf %72, %73 : vector<1x128xf32>
    %cst_29 = arith.constant 9.99999974E-6 : f32
    %75 = vector.broadcast %cst_29 : f32 to vector<1x128xf32>
    %76 = arith.addf %74, %75 : vector<1x128xf32>
    %77 = math.rsqrt %76 : vector<1x128xf32>
    %78 = arith.mulf %62, %77 : vector<1x128xf32>
    %79 = vector.broadcast %78 : vector<1x128xf32> to vector<8x128xf32>
    %80 = arith.mulf %69, %79 : vector<8x128xf32>
    %81 = vector.broadcast %63 : vector<1x128xf32> to vector<8x128xf32>
    %82 = arith.addf %80, %81 : vector<8x128xf32>
    %cst_30 = arith.constant 0.000000e+00 : f32
    %83 = vector.broadcast %cst_30 : f32 to vector<8x128xf32>
    %84 = arith.cmpf oge, %82, %83 : vector<8x128xf32>
    %cst_31 = arith.constant 0.00999999977 : f32
    %85 = vector.broadcast %cst_31 : f32 to vector<8x128xf32>
    %86 = arith.mulf %85, %82 : vector<8x128xf32>
    %87 = arith.select %84, %82, %86 : vector<8x128xi1>, vector<8x128xf32>
    %88 = math.tanh %87 : vector<8x128xf32>
    %c0_32 = arith.constant 0 : index
    %c0_33 = arith.constant 0 : index
    %89 = vector.load %arg5[%c0_32, %c0_33] : memref<8x128xf32, #tpu.memory_space<vmem>>, vector<8x128xf32>
    tpu.vector_store %arg5[%c0_32, %c0_33], %88 {strides = array<i32>} : memref<8x128xf32, #tpu.memory_space<vmem>>, vector<8x128xf32>,
    return
  }
}

</mosaic_0001>

<bundles_post_ra>
// kernel: linear_generator_forward.1
= control target key start
LH: loop header
LB: loop body
LE: loop exit
PB: predicated region body
PF: predicated region fallthrough
CT: control target
= control target key end

     0   :  { %10 = vsyncpa [#allocation3], 0  ;;  %s893_s0 = inlined_call_operand.vmem [shape: bf16[8,128], index: 0, kind: input, shape index: {}]   ;;  %s894_s1 = inlined_call_operand.hbm [shape: bf16[128,128], index: 1, kind: input, shape index: {}]   ;;  %s895_s2 = inlined_call_operand.hbm [shape: bf16[128,128], index: 2, kind: input, shape index: {}]   ;;  %s896_s3 = inlined_call_operand.hbm [shape: bf16[128,128], index: 3, kind: input, shape index: {}]   ;;  %s897_s4 = inlined_call_operand.vmem [shape: f32[8,128], index: 4, kind: input, shape index: {}]   ;;  %s898_s5 = inlined_call_operand.hbm [shape: f32[8,128], index: 5, kind: output, shape index: {}]  }
   0x1   :  { %11 = vsyncpa [#allocation6], 0 }
   0x2   :  { %12 = vsyncpa [#allocation4], 0  ;;  %s739_s18 = smov [#allocation5]   ;;  %s740_s20 = smov [#allocation2]  }
   0x3   :  { %s32_s19 = sshll.u32 %s739_s18, 4  ;;  %s20_s21 = sshll.u32 %s740_s20, 4  ;;  %s33_s19 = int_to_ptr.vmem [resolvable:$true] %s32_s19  ;;  %s777_s21 = int_to_ptr.vmem [resolvable:$true] %s20_s21 }
   0x4   :  { %s645_s24 = scalar_lea.hbm %s895_s2, 1024 }
   0x5   :  { %p646_p0 = scmp.ne.s32.totalorder %s895_s2, %s645_s24  ;;  %p649_p1 = scmp.lt.u32.totalorder %s645_s24, %s895_s2 }
   0x7   :  { %p651_p2 = pnand %p649_p1, %p646_p0 }
   0x9   :  { %654 = shalt.err (!%p651_p2)
}
   0xa   :  { %s655_s29 = scalar_lea.vmem %s33_s19, 1024  ;;  %p660_p4 = scmp.lt.s32.totalorder %s33_s19, %s33_s19 }
   0xb   :  { %p656_p3 = scmp.ne.s32.totalorder %s33_s19, %s655_s29  ;;  %p661_p5 = scmp.lt.s32.totalorder %s655_s29, %s655_s29 }
   0xd   :  { %p662_p6 = por %p661_p5, %p660_p4 }
   0xf   :  { %p663_p7 = pnand %p662_p6, %p656_p3 }
  0x11   :  { %666 = shalt.err (!%p663_p7)
}
  0x12   :  { %s741_s30 = smov 64   ;;  %s742_s6 = smov 4  }
  0x13   :  { %38 = dma.hbm_to_vmem [thread:$0]  %s895_s2, 1024, %s33_s19, [#allocation6], %s741_s30, %s741_s30, %s742_s6  }
  0x14   :  { %s667_s11 = scalar_lea.hbm %s894_s1, 1024 }
  0x15   :  { %p668_p8 = scmp.ne.s32.totalorder %s894_s1, %s667_s11  ;;  %p671_p9 = scmp.lt.u32.totalorder %s667_s11, %s894_s1 }
  0x17   :  { %p673_p10 = pnand %p671_p9, %p668_p8 }
  0x19   :  { %676 = shalt.err (!%p673_p10)
}
  0x1a   :  { %s677_s16 = scalar_lea.vmem %s777_s21, 1024  ;;  %p682_p12 = scmp.lt.s32.totalorder %s777_s21, %s777_s21 }
  0x1b   :  { %p678_p11 = scmp.ne.s32.totalorder %s777_s21, %s677_s16  ;;  %p683_p13 = scmp.lt.s32.totalorder %s677_s16, %s677_s16 }
  0x1d   :  { %p684_p0 = por %p683_p13, %p682_p12 }
  0x1f   :  { %p685_p1 = pnand %p684_p0, %p678_p11 }
  0x21   :  { %688 = shalt.err (!%p685_p1)
}
  0x22   :  { %26 = dma.hbm_to_vmem [thread:$0]  %s894_s1, 1024, %s777_s21, [#allocation3], %s741_s30, %s741_s30, %s742_s6  }
  0x23   :  { %s743_s18 = smov [#allocation7]   ;;  %s689_s23 = scalar_lea.hbm %s896_s3, 1024 }
  0x24   :  { %s44_s19 = sshll.u32 %s743_s18, 4  ;;  %p690_p2 = scmp.ne.s32.totalorder %s896_s3, %s689_s23  ;;  %s45_s19 = int_to_ptr.vmem [resolvable:$true] %s44_s19 }
  0x25   :  { %p693_p3 = scmp.lt.u32.totalorder %s689_s23, %s896_s3 }
  0x27   :  { %p695_p4 = pnand %p693_p3, %p690_p2 }
  0x29   :  { %698 = shalt.err (!%p695_p4)
}
  0x2a   :  { %s699_s28 = scalar_lea.vmem %s45_s19, 1024  ;;  %p704_p6 = scmp.lt.s32.totalorder %s45_s19, %s45_s19 }
  0x2b   :  { %p700_p5 = scmp.ne.s32.totalorder %s45_s19, %s699_s28  ;;  %p705_p7 = scmp.lt.s32.totalorder %s699_s28, %s699_s28 }
  0x2d   :  { %p706_p8 = por %p705_p7, %p704_p6 }
  0x2f   :  { %p707_p9 = pnand %p706_p8, %p700_p5 }
  0x31   :  { %710 = shalt.err (!%p707_p9)
}
  0x32   :  { %50 = dma.hbm_to_vmem [thread:$0]  %s896_s3, 1024, %s45_s19, [#allocation6], %s741_s30, %s741_s30, %s742_s6  }
  0x33   :  { %733 = dma.done.wait [#allocation3], 1024  }
  0x34   :  { %734 = vsyncadd [#allocation3], 4294966272 }
  0x35   :  { %735 = dma.done.wait [#allocation6], 2048  }
  0x36   :  { %736 = vsyncadd [#allocation6], 4294965248  ;;  %v744_v0 = vmov 0.0   ;;  %vm745_vm0 = vmmov 0   ;;  %v613_v1 = vld [vmem:[#allocation2] sm:$0xff]   ;;  %v614_v2 = vld [vmem:[#allocation2 + $0x8] sm:$0xff]   ;;  %v189_v39 = vlaneseq }
  0x37   :  { %545 = vmatprep.subr.bf16.mxu0 %v744_v0  ;;  %561 = vmatprep.mubr.msk.bf16.mxu0 %vm745_vm0, %v744_v0  ;;  %v615_v3 = vld [vmem:[#allocation2 + $0x10] sm:$0xff]   ;;  %v616_v4 = vld [vmem:[#allocation2 + $0x18] sm:$0xff]   ;;  %v617_v5 = vld [vmem:[#allocation2 + $0x20] sm:$0xff]  }
  0x38   :  { %565 = vmatprep.subr.bf16.mxu1 %v744_v0  ;;  %581 = vmatprep.mubr.msk.bf16.mxu1 %vm745_vm0, %v744_v0  ;;  %v618_v6 = vld [vmem:[#allocation2 + $0x28] sm:$0xff]   ;;  %v619_v7 = vld [vmem:[#allocation2 + $0x30] sm:$0xff]   ;;  %v620_v8 = vld [vmem:[#allocation2 + $0x38] sm:$0xff]   ;;  %v855_v40 = vshrl.u32 %v189_v39, 7 }
  0x39   :  { %546 = vmatpush3.bf16.msra.mxu0 %v613_v1  ;;  %v64_v9 = vld [vmem:[%s893_s0] sm:$0xf]  ;;  %v622_v11 = vld [vmem:[#allocation5 + $0x8] sm:$0xff]   ;;  %v623_v12 = vld [vmem:[#allocation5 + $0x10] sm:$0xff]  }
  0x3a   :  { %547 = vmatprep.subr.bf16.mxu0 %v744_v0  ;;  %v621_v10 = vld [vmem:[#allocation5] sm:$0xff]   ;;  %v624_v13 = vld [vmem:[#allocation5 + $0x18] sm:$0xff]   ;;  %v626_v15 = vld [vmem:[#allocation5 + $0x28] sm:$0xff]   ;;  %v191_v42 = vsub.s32 0, %v855_v40  ;;  %v196_v43 = vsub.s32 1, %v855_v40 }
  0x3b   :  { %566 = vmatpush3.bf16.msra.mxu1 %v621_v10  ;;  %v625_v14 = vld [vmem:[#allocation5 + $0x20] sm:$0xff]   ;;  %v627_v16 = vld [vmem:[#allocation5 + $0x30] sm:$0xff]   ;;  %v628_v17 = vld [vmem:[#allocation5 + $0x38] sm:$0xff]  }
  0x3c   :  { %567 = vmatprep.subr.bf16.mxu1 %v744_v0  ;;  %v860_v41 = vld [vmem:[%s897_s4] sm:$0xff]  ;;  %v630_v54 = vld [vmem:[#allocation7 + $0x8] sm:$0xff]   ;;  %v631_v55 = vld [vmem:[#allocation7 + $0x10] sm:$0xff]   ;;  %s746_s4 = smov [#allocation8]  }
  0x3d   :  { %548 = vmatpush3.bf16.msra.mxu0 %v614_v2  ;;  %v197_v47 = vrot.slane %v860_v41, %v196_v43  ;;  %v629_v53 = vld [vmem:[#allocation7] sm:$0xff]   ;;  %v632_v56 = vld [vmem:[#allocation7 + $0x18] sm:$0xff]   ;;  %v634_v58 = vld [vmem:[#allocation7 + $0x28] sm:$0xff]   ;;  %s484_s6 = sshll.u32 %s746_s4, 4  ;;  %s485_s6 = int_to_ptr.vmem [resolvable:$true] %s484_s6 }
  0x3e   :  { %549 = vmatprep.subr.bf16.mxu0 %v744_v0  ;;  %v633_v57 = vld [vmem:[#allocation7 + $0x20] sm:$0xff]   ;;  %v635_v59 = vld [vmem:[#allocation7 + $0x30] sm:$0xff]   ;;  %v636_v60 = vld [vmem:[#allocation7 + $0x38] sm:$0xff]   ;;  %s711_s7 = scalar_lea.vmem %s485_s6, 128  ;;  %p716_p11 = scmp.lt.s32.totalorder %s485_s6, %s485_s6 }
  0x3f   :  { %568 = vmatpush3.bf16.msra.mxu1 %v622_v11  ;;  %p712_p10 = scmp.ne.s32.totalorder %s485_s6, %s711_s7  ;;  %p717_p12 = scmp.lt.s32.totalorder %s711_s7, %s711_s7 }
  0x40   :  { %569 = vmatprep.subr.bf16.mxu1 %v744_v0 }
  0x41   :  { %550 = vmatpush3.bf16.msra.mxu0 %v615_v3  ;;  %p718_p13 = por %p717_p12, %p716_p11 }
  0x42   :  { %551 = vmatprep.subr.bf16.mxu0 %v744_v0 }
  0x43   :  { %570 = vmatpush3.bf16.msra.mxu1 %v623_v12  ;;  %p719_p0 = pnand %p718_p13, %p712_p10 }
  0x44   :  { %571 = vmatprep.subr.bf16.mxu1 %v744_v0 }
  0x45   :  { %552 = vmatpush3.bf16.msra.mxu0 %v616_v4 }
  0x46   :  { %553 = vmatprep.subr.bf16.mxu0 %v744_v0 }
  0x47   :  { %572 = vmatpush3.bf16.msra.mxu1 %v624_v13 }
  0x48   :  { %573 = vmatprep.subr.bf16.mxu1 %v744_v0 }
  0x49   :  { %554 = vmatpush3.bf16.msra.mxu0 %v617_v5 }
  0x4a   :  { %555 = vmatprep.subr.bf16.mxu0 %v744_v0 }
  0x4b   :  { %574 = vmatpush3.bf16.msra.mxu1 %v625_v14 }
  0x4c   :  { %575 = vmatprep.subr.bf16.mxu1 %v744_v0 }
  0x4d   :  { %556 = vmatpush3.bf16.msra.mxu0 %v618_v6 }
  0x4e   :  { %557 = vmatprep.subr.bf16.mxu0 %v744_v0 }
  0x4f   :  { %576 = vmatpush3.bf16.msra.mxu1 %v626_v15 }
  0x50   :  { %577 = vmatprep.subr.bf16.mxu1 %v744_v0 }
  0x51   :  { %558 = vmatpush3.bf16.msra.mxu0 %v619_v7 }
  0x52   :  { %559 = vmatprep.subr.bf16.mxu0 %v744_v0 }
  0x53   :  { %578 = vmatpush3.bf16.msra.mxu1 %v627_v16 }
  0x54   :  { %579 = vmatprep.subr.bf16.mxu1 %v744_v0 }
  0x55   :  { %560 = vmatpush3.bf16.msra.mxu0 %v620_v8 }
  0x56   :  { %585 = vmatprep.subr.bf16.mxu0 %v744_v0 }
  0x57   :  { %580 = vmatpush3.bf16.msra.mxu1 %v628_v17 }
  0x58   :  { %562 = vmatmul.mubr.bf16.vlgmr.msra.gmra.mrb[0].mxu0 %v64_v9 }
  0x59   :  { %601 = vmatprep.mubr.msk.bf16.mxu0 %vm745_vm0, %v744_v0  ;;  %586 = vmatpush3.bf16.msra.mxu0 %v629_v53  ;;  %v470_v53 = vsub.s32 5, %v855_v40 }
  0x5a   :  { %587 = vmatprep.subr.bf16.mxu0 %v744_v0 }
  0x5d   :  { %588 = vmatpush3.bf16.msra.mxu0 %v630_v54 }
  0x5e   :  { %589 = vmatprep.subr.bf16.mxu0 %v744_v0 }
  0x61   :  { %590 = vmatpush3.bf16.msra.mxu0 %v631_v55 }
  0x62   :  { %591 = vmatprep.subr.bf16.mxu0 %v744_v0 }
  0x65   :  { %592 = vmatpush3.bf16.msra.mxu0 %v632_v56 }
  0x66   :  { %593 = vmatprep.subr.bf16.mxu0 %v744_v0 }
  0x69   :  { %594 = vmatpush3.bf16.msra.mxu0 %v633_v57  ;;  %v471_v57 = vrot.slane %v860_v41, %v470_v53 }
  0x6a   :  { %595 = vmatprep.subr.bf16.mxu0 %v744_v0 }
  0x6d   :  { %596 = vmatpush3.bf16.msra.mxu0 %v634_v58 }
  0x6e   :  { %597 = vmatprep.subr.bf16.mxu0 %v744_v0 }
  0x71   :  { %598 = vmatpush3.bf16.msra.mxu0 %v635_v59 }
  0x72   :  { %599 = vmatprep.subr.bf16.mxu0 %v744_v0 }
  0x75   :  { %600 = vmatpush3.bf16.msra.mxu0 %v636_v60 }
 0x12b   :  { %v163_v18 = vpop.f32.mrb[0].mxu0 }
 0x12c   :  { %v169_v19 = vrot.slane %v163_v18, 4  ;;  %v563_v20 = vpop.f32.mrb[1].mxu0 }
 0x12d   :  { %v166_v21 = vpop.f32.mrb[2].mxu0 }
 0x12e   :  { %v170_v22 = vadd.f32 %v169_v19, %v163_v18  ;;  %v564_v23 = vpop.f32.mrb[3].mxu0  ;;  %v333_v19 = vsub.s32 3, %v855_v40 }
 0x130   :  { %v171_v24 = vrot.slane %v170_v22, 2  ;;  %v334_v23 = vrot.slane %v860_v41, %v333_v19 }
 0x132   :  { %v172_v25 = vadd.f32 %v171_v24, %v170_v22 }
 0x134   :  { %v173_v26 = vrot.slane %v172_v25, 1 }
 0x136   :  { %v174_v27 = vadd.f32 %v173_v26, %v172_v25 }
 0x138   :  { %v176_v28 = vmul.f32 0.125, %v174_v27 }
 0x13a   :  { %v177_v29 = vsub.f32 %v163_v18, %v176_v28  ;;  %v328_v18 = vsub.s32 2, %v855_v40 }
 0x13c   :  { %v178_v30 = vmul.f32 %v177_v29, %v177_v29 }
 0x13e   :  { %v179_v31 = vrot.slane %v178_v30, 4 }
 0x140   :  { %v180_v32 = vadd.f32 %v179_v31, %v178_v30 }
 0x142   :  { %v181_v33 = vrot.slane %v180_v32, 2 }
 0x144   :  { %v182_v34 = vadd.f32 %v181_v33, %v180_v32 }
 0x146   :  { %v183_v35 = vrot.slane %v182_v34, 1 }
 0x148   :  { %v184_v36 = vadd.f32 %v183_v35, %v182_v34 }
 0x14a   :  { %v185_v37 = vmul.f32 0.125, %v184_v36 }
 0x14c   :  { %v186_v38 = vadd.f32 1e-05, %v185_v37 }
 0x14e   :  { %637 = vrsqrt.f32 %v186_v38 }
 0x158   :  { %v638_v44 = vpop.eup %637 }
 0x159   :  { %v188_v45 = vmul.f32 %v638_v44, %v860_v41 }
 0x15b   :  { %v192_v46 = vrot.slane %v188_v45, %v191_v42 }
 0x15d   :  { %v193_v48 = vmul.f32 %v192_v46, %v177_v29 }
 0x15f   :  { %v198_v49 = vadd.f32 %v197_v47, %v193_v48 }
 0x161   :  { %vm199_vm1 = vcmp.ge.f32.partialorder %v198_v49, 0.0  ;;  %v200_v50 = vmul.f32 0.01, %v198_v49 }
 0x163   :  { %v201_v51 = vsel %vm199_vm1, %v198_v49, %v200_v50 }
 0x164   :  { %v202_v52 = vpack.c.bf16 %v201_v51, %v201_v51 }
 0x166   :  { %582 = vmatmul.mubr.bf16.vlgmr.msra.gmra.mrb[0].mxu1 %v202_v52  ;;  %v465_v52 = vsub.s32 4, %v855_v40 }
 0x239   :  { %v301_v61 = vpop.f32.mrb[0].mxu1 }
 0x23a   :  { %v307_v62 = vrot.slane %v301_v61, 4  ;;  %v583_v63 = vpop.f32.mrb[1].mxu1 }
 0x23b   :  { %v304_v1 = vpop.f32.mrb[2].mxu1 }
 0x23c   :  { %v308_v2 = vadd.f32 %v307_v62, %v301_v61  ;;  %v584_v3 = vpop.f32.mrb[3].mxu1 }
 0x23e   :  { %v309_v4 = vrot.slane %v308_v2, 2 }
 0x240   :  { %v310_v5 = vadd.f32 %v309_v4, %v308_v2 }
 0x242   :  { %v311_v6 = vrot.slane %v310_v5, 1 }
 0x244   :  { %v312_v7 = vadd.f32 %v311_v6, %v310_v5 }
 0x246   :  { %v313_v8 = vmul.f32 0.125, %v312_v7 }
 0x248   :  { %v314_v9 = vsub.f32 %v301_v61, %v313_v8 }
 0x24a   :  { %v315_v10 = vmul.f32 %v314_v9, %v314_v9 }
 0x24c   :  { %v316_v11 = vrot.slane %v315_v10, 4 }
 0x24e   :  { %v317_v12 = vadd.f32 %v316_v11, %v315_v10 }
 0x250   :  { %v318_v13 = vrot.slane %v317_v12, 2 }
 0x252   :  { %v319_v14 = vadd.f32 %v318_v13, %v317_v12 }
 0x254   :  { %v320_v0 = vrot.slane %v319_v14, 1 }
 0x256   :  { %v321_v15 = vadd.f32 %v320_v0, %v319_v14 }
 0x258   :  { %v322_v16 = vmul.f32 0.125, %v321_v15 }
 0x25a   :  { %v323_v17 = vadd.f32 1e-05, %v322_v16 }
 0x25c   :  { %639 = vrsqrt.f32 %v323_v17 }
 0x266   :  { %v640_v20 = vpop.eup %639 }
 0x267   :  { %v325_v21 = vmul.f32 %v640_v20, %v860_v41 }
 0x269   :  { %v329_v22 = vrot.slane %v325_v21, %v328_v18 }
 0x26b   :  { %v330_v24 = vmul.f32 %v329_v22, %v314_v9 }
 0x26d   :  { %v335_v25 = vadd.f32 %v334_v23, %v330_v24 }
 0x26f   :  { %v337_v26 = vmul.f32 0.01, %v335_v25  ;;  %vm336_vm2 = vcmp.ge.f32.partialorder %v335_v25, 0.0 }
 0x271   :  { %v338_v27 = vsel %vm336_vm2, %v335_v25, %v337_v26 }
 0x272   :  { %v339_v28 = vpack.c.bf16 %v338_v27, %v338_v27 }
 0x274   :  { %602 = vmatmul.mubr.bf16.vlgmr.msra.gmra.mrb[4].mxu0 %v339_v28 }
 0x347   :  { %v438_v29 = vpop.f32.mrb[4].mxu0 }
 0x348   :  { %v444_v30 = vrot.slane %v438_v29, 4  ;;  %v603_v31 = vpop.f32.mrb[5].mxu0 }
 0x349   :  { %v441_v32 = vpop.f32.mrb[6].mxu0 }
 0x34a   :  { %v445_v33 = vadd.f32 %v444_v30, %v438_v29  ;;  %v604_v34 = vpop.f32.mrb[7].mxu0 }
 0x34c   :  { %v446_v35 = vrot.slane %v445_v33, 2 }
 0x34e   :  { %v447_v36 = vadd.f32 %v446_v35, %v445_v33 }
 0x350   :  { %v448_v37 = vrot.slane %v447_v36, 1 }
 0x352   :  { %v449_v38 = vadd.f32 %v448_v37, %v447_v36 }
 0x354   :  { %v450_v39 = vmul.f32 0.125, %v449_v38 }
 0x356   :  { %v451_v42 = vsub.f32 %v438_v29, %v450_v39 }
 0x358   :  { %v452_v43 = vmul.f32 %v451_v42, %v451_v42 }
 0x35a   :  { %v453_v44 = vrot.slane %v452_v43, 4 }
 0x35c   :  { %v454_v45 = vadd.f32 %v453_v44, %v452_v43 }
 0x35e   :  { %v455_v46 = vrot.slane %v454_v45, 2 }
 0x360   :  { %v456_v47 = vadd.f32 %v455_v46, %v454_v45 }
 0x362   :  { %v457_v48 = vrot.slane %v456_v47, 1 }
 0x364   :  { %v458_v49 = vadd.f32 %v457_v48, %v456_v47 }
 0x366   :  { %v459_v50 = vmul.f32 0.125, %v458_v49 }
 0x368   :  { %v460_v51 = vadd.f32 1e-05, %v459_v50 }
 0x36a   :  { %641 = vrsqrt.f32 %v460_v51 }
 0x374   :  { %v642_v54 = vpop.eup %641 }
 0x375   :  { %v462_v55 = vmul.f32 %v642_v54, %v860_v41 }
 0x377   :  { %v466_v56 = vrot.slane %v462_v55, %v465_v52 }
 0x379   :  { %v467_v58 = vmul.f32 %v466_v56, %v451_v42 }
 0x37b   :  { %v472_v59 = vadd.f32 %v471_v57, %v467_v58 }
 0x37d   :  { %vm473_vm3 = vcmp.ge.f32.partialorder %v472_v59, 0.0  ;;  %v474_v60 = vmul.f32 0.01, %v472_v59 }
 0x37f   :  { %v475_v61 = vsel %vm473_vm3, %v472_v59, %v474_v60 }
 0x380   :  { %643 = vtanh.f32 %v475_v61 }
 0x38a   :  { %v644_v62 = vpop.eup %643 }
 0x38b   :  { %477 = vst [vmem:[#allocation8] sm:$0xff] %v644_v62 }
 0x38c   :  { %722 = shalt.err (!%p719_p0)
}
 0x38d   :  { %s723_s10 = scalar_lea.hbm %s898_s5, 128 }
 0x38e   :  { %p724_p1 = scmp.ne.s32.totalorder %s898_s5, %s723_s10  ;;  %p727_p2 = scmp.lt.u32.totalorder %s723_s10, %s898_s5 }
 0x390   :  { %p729_p3 = pnand %p727_p2, %p724_p1 }
 0x392   :  { %732 = shalt.err (!%p729_p3)
}
 0x393   :  { %487 = dma.vmem_to_hbm [thread:$0]  %s485_s6, 128, %s898_s5, [#allocation4]  }
 0x394   :  { %737 = dma.done.wait [#allocation4], 128  }
 0x395   :  { %738 = vsyncadd [#allocation4], 4294967168 }
 0x396   :  { %491 = vsyncpa [#allocation3], 1 }
 0x397   :  { %492 = vsyncpa [#allocation6], 1 }
 0x398   :  { %493 = vsyncpa [#allocation4], 1 }

</bundles_post_ra>
